<compile_context>
chip_gen: v7x
topology: tpu7x:2x2x1
jax: 0.10.0
libtpu: 0.0.40
codegen_flags: <defaults>
</compile_context>

<pallas_src>
import functools

import jax
import jax.numpy as jnp
from jax.experimental import pallas as pl
from jax.experimental.pallas import tpu as pltpu

BN_EPS = 1e-5
_HIDDEN = 5                       # lin1 out / BN features / lin2 in
_DEFAULT_TILE_N = 8192            # rows per tile (multiple of 128)
_NUM_CORES = 2                    # v7x megacore split; harmless on 1-TC chips
_SUB = 8                          # sublane padding for tiny per-core stats
_VMEM_LIMIT = 48 * 1024 * 1024    # scoped VMEM; below v7x's 64 MiB physical


def _round_up(v, m):
    return (v + m - 1) // m * m


def _choose_tile(n, p, tile_n):
    """Pick a 128-multiple row tile that fits double-buffered in scoped VMEM."""
    if tile_n is None:
        tile_n = _DEFAULT_TILE_N
    bytes_per_row = _round_up(max(p, 1), 128) * 4          # lane-padded f32 row
    cap = max(128, ((36 * 1024 * 1024) // (2 * bytes_per_row)) // 128 * 128)
    tile = min(_round_up(tile_n, 128), cap, _round_up(n, 128))
    return max(128, tile)


@functools.partial(jax.jit, static_argnames=("tile_n",))
def linear_regression_forward(x, params, *, tile_n=None):
    """x: (N, p) f32. params: w1(p,5) b1(1,5) gamma(1,5) beta(1,5) w2(5,1) b2(1,1)."""
    n, p = x.shape
    h = _HIDDEN
    w1, b1 = params["w1"], params["b1"]
    gamma, beta = params["gamma"], params["beta"]
    w2, b2 = params["w2"], params["b2"]

    tile = _choose_tile(n, p, tile_n)
    num_tiles = (n + tile - 1) // tile
    tpc = (num_tiles + _NUM_CORES - 1) // _NUM_CORES        # tiles per core
    rem = n % tile                                          # rows in last tile
    last = num_tiles - 1

    # ------------- pass 1: global batch statistics of h = x @ w1 + b1 -------
    # Per core: shifted sums  s1 = sum(h - shift), s2 = sum((h - shift)^2),
    # with shift = h of the first row the core sees (kills cancellation).
    def stats_kernel(x_ref, w1_ref, b1_ref, shift_ref, sum_ref, sumsq_ref):
        c = pl.program_id(0)
        t = pl.program_id(1)
        g = c * tpc + t                       # global tile id (may be phantom)

        @pl.when(t == 0)
        def _init():
            sum_ref[...] = jnp.zeros_like(sum_ref)
            sumsq_ref[...] = jnp.zeros_like(sumsq_ref)
            shift_ref[...] = jnp.zeros_like(shift_ref)

            @pl.when(g < num_tiles)           # core actually has work
            def _set_shift():
                first = jnp.dot(x_ref[0:1, :], w1_ref[...],
                                preferred_element_type=jnp.float32) + b1_ref[...]
                shift_ref[...] = jnp.broadcast_to(first[None], (1, _SUB, h))

        def _accum(d):                        # d: (tile, h) shifted, masked rows = 0
            sum_ref[...] += jnp.sum(d, axis=0, keepdims=True)[None]
            sumsq_ref[...] += jnp.sum(d * d, axis=0, keepdims=True)[None]

        # Full tiles: no row mask (mask only exists on the last tile).
        if rem == 0:
            full_cond = g < num_tiles
        else:
            full_cond = jnp.logical_and(g < num_tiles, g != last)

        @pl.when(full_cond)
        def _full_tile():
            hh = jnp.dot(x_ref[...], w1_ref[...],
                         preferred_element_type=jnp.float32) + b1_ref[...]
            _accum(hh - shift_ref[...][:, 0, :])

        if rem:                               # static: last tile is partial
            @pl.when(g == last)
            def _partial_tile():
                row = jax.lax.broadcasted_iota(jnp.int32, (tile, 1), 0)
                keep = row < rem
                xm = jnp.where(keep, x_ref[...], 0.0)      # mask before the dot
                hh = jnp.dot(xm, w1_ref[...],
                             preferred_element_type=jnp.float32) + b1_ref[...]
                _accum(jnp.where(keep, hh - shift_ref[...][:, 0, :], 0.0))

    stat_shape = jax.ShapeDtypeStruct((_NUM_CORES, _SUB, h), jnp.float32)
    stat_spec = pl.BlockSpec((1, _SUB, h), lambda c, t: (c, 0, 0))
    shift_o, sum_o, sumsq_o = pl.pallas_call(
        stats_kernel,
        out_shape=(stat_shape, stat_shape, stat_shape),
        grid=(_NUM_CORES, tpc),
        in_specs=[
            # clamp phantom steps to the last valid tile (guarded in-kernel)
            pl.BlockSpec((tile, p),
                         lambda c, t: (jnp.minimum(c * tpc + t, last), 0)),
            pl.BlockSpec((p, h), lambda c, t: (0, 0)),      # resident params
            pl.BlockSpec((1, h), lambda c, t: (0, 0)),
        ],
        out_specs=(stat_spec, stat_spec, stat_spec),
        compiler_params=pltpu.CompilerParams(
            dimension_semantics=("parallel", "arbitrary"),
            vmem_limit_bytes=_VMEM_LIMIT),
    )(x, w1, b1)

    # ----- combine per-core shifted sums (tiny, plain JAX) ------------------
    shift = shift_o[:, 0, :]                                 # (cores, h)
    s1 = sum_o[:, 0, :]
    s2 = sumsq_o[:, 0, :]
    counts = []
    for c in range(_NUM_CORES):
        lo = min(n, c * tpc * tile)
        hi = min(n, (c + 1) * tpc * tile)
        counts.append(float(hi - lo))
    cnt = jnp.array(counts, jnp.float32).reshape(_NUM_CORES, 1)
    delta = shift - shift[0:1, :]                            # re-shift to core-0 frame
    inv_n = 1.0 / n
    s1_g = jnp.sum(s1 + cnt * delta, axis=0, keepdims=True)
    s2_g = jnp.sum(s2 + 2.0 * delta * s1 + cnt * delta * delta,
                   axis=0, keepdims=True)
    mean = shift[0:1, :] + s1_g * inv_n                      # (1, h)
    var = jnp.maximum(s2_g * inv_n - (s1_g * inv_n) ** 2, 0.0)  # biased variance

    # ----- fold BN affine + lin2 into a single (p,1) projection -------------
    a = gamma * jax.lax.rsqrt(var + BN_EPS)                  # (1, h)
    w_scaled = a.reshape(h, 1) * w2                          # (h, 1)
    w_row = (w1 @ w_scaled).T                                # (1, p)
    c_eff = b1 @ w_scaled + (beta - mean * a) @ w2 + b2      # (1, 1)

    # ------------- pass 2: lane-dense apply  out[n] = x[n,:]@w_eff + c ------
    def apply_kernel(x_ref, w_ref, c_ref, o_ref):
        # (1,p) x (tile,p) contracted on features -> (1, tile): batch lands on
        # lanes, every store is a full-width unmasked row.
        y = jax.lax.dot_general(
            w_ref[...], x_ref[...],
            dimension_numbers=(((1,), (1,)), ((), ())),
            preferred_element_type=jnp.float32)
        o_ref[...] = (y + c_ref[...]).astype(o_ref.dtype)

    n_out = num_tiles * tile                                 # padded output row
    out_row = pl.pallas_call(
        apply_kernel,
        out_shape=jax.ShapeDtypeStruct((1, n_out), jnp.float32),
        grid=(num_tiles,),
        in_specs=[
            pl.BlockSpec((tile, p), lambda i: (i, 0)),
            pl.BlockSpec((1, p), lambda i: (0, 0)),          # resident folded weight
            pl.BlockSpec((1, 1), lambda i: (0, 0)),          # resident folded bias
        ],
        out_specs=pl.BlockSpec((1, tile), lambda i: (0, i)),
        compiler_params=pltpu.CompilerParams(
            dimension_semantics=("parallel",),
            vmem_limit_bytes=_VMEM_LIMIT),
    )(x, w_row, c_eff)

    return out_row[0, :n].reshape(n, 1)


def init_params(key, p):
    """Mirror nn.Linear uniform(-1/sqrt(fan_in), ...) init and BN (gamma=1, beta=0)."""
    k1, k2, k3, k4 = jax.random.split(key, 4)
    bound1 = 1.0 / jnp.sqrt(jnp.float32(p))
    bound2 = 1.0 / jnp.sqrt(jnp.float32(_HIDDEN))
    return {
        "w1": jax.random.uniform(k1, (p, _HIDDEN), jnp.float32, -bound1, bound1),
        "b1": jax.random.uniform(k2, (1, _HIDDEN), jnp.float32, -bound1, bound1),
        "gamma": jnp.ones((1, _HIDDEN), jnp.float32),
        "beta": jnp.zeros((1, _HIDDEN), jnp.float32),
        "w2": jax.random.uniform(k3, (_HIDDEN, 1), jnp.float32, -bound2, bound2),
        "b2": jax.random.uniform(k4, (1, 1), jnp.float32, -bound2, bound2),
    }


def reference_forward(x, params):
    """Pure-JAX reference (PyTorch training-mode BatchNorm1d semantics)."""
    hh = x @ params["w1"] + params["b1"]
    mean = jnp.mean(hh, axis=0, keepdims=True)
    var = jnp.mean((hh - mean) ** 2, axis=0, keepdims=True)
    h_bn = (hh - mean) / jnp.sqrt(var + BN_EPS) * params["gamma"] + params["beta"]
    return h_bn @ params["w2"] + params["b2"]


if __name__ == "__main__":
    key = jax.random.PRNGKey(0)
    k_x, k_p, k_x2 = jax.random.split(key, 3)

    p = _HIDDEN          # module is used with x.view(-1, 5) -> p = 5
    params = init_params(k_p, p)

    # Test 1: small batch (single partial tile, idle second core).
    N = 16
    x = jax.random.normal(k_x, (N, p), jnp.float32) * 2.0 + 3.0   # nonzero mean
    out = jax.block_until_ready(linear_regression_forward(x, params))
    ref = reference_forward(x, params)
    assert out.shape == (N, 1), out.shape
    assert jnp.allclose(out, ref, atol=1e-4, rtol=1e-4), "mismatch vs reference"

    # Test 2: default big tile (8192), multi-tile per core, partial last tile,
    # phantom grid step on core 1, cross-core shifted-stat combine.
    N2 = 20000
    x2 = jax.random.normal(k_x2, (N2, p), jnp.float32) * 2.0 + 3.0
    out2 = jax.block_until_ready(linear_regression_forward(x2, params))
    ref2 = reference_forward(x2, params)
    assert out2.shape == (N2, 1), out2.shape
    assert jnp.allclose(out2, ref2, atol=5e-4, rtol=5e-4), "tiled mismatch"

    print("KERNEL_OK")
</pallas_src>

<mosaic_0001>
module attributes {stable_mosaic.version = 11 : i64} {
  func.func @stats_kernel(%arg0: i32, %arg1: i32, %arg2: memref<128x5xf32, #tpu.memory_space<vmem>>, %arg3: memref<5x5xf32, #tpu.memory_space<vmem>>, %arg4: memref<1x5xf32, #tpu.memory_space<vmem>>, %arg5: memref<1x8x5xf32, #tpu.memory_space<vmem>>, %arg6: memref<1x8x5xf32, #tpu.memory_space<vmem>>, %arg7: memref<1x8x5xf32, #tpu.memory_space<vmem>>) attributes {dimension_semantics = [#tpu.dimension_semantics<parallel>, #tpu.dimension_semantics<arbitrary>], iteration_bounds = array<i64: 2, 1>, scalar_prefetch = 0 : i64, scratch_operands = 0 : i64, tpu.core_type = #tpu.core_type<tc>, window_params = [{transform_indices = @transform_0, window_bounds = array<i64: 128, 5>}, {pipeline_mode = #tpu.pipeline_mode<synchronous>, transform_indices = @transform_1, window_bounds = array<i64: 5, 5>}, {pipeline_mode = #tpu.pipeline_mode<synchronous>, transform_indices = @transform_2, window_bounds = array<i64: 1, 5>}, {transform_indices = @transform_3, window_bounds = array<i64: 1, 8, 5>}, {transform_indices = @transform_4, window_bounds = array<i64: 1, 8, 5>}, {transform_indices = @transform_5, window_bounds = array<i64: 1, 8, 5>}]} {
    %c1_i32 = arith.constant 1 : i32
    %0 = arith.muli %arg0, %c1_i32 : i32
    %1 = arith.addi %0, %arg1 : i32
    %c0_i32 = arith.constant 0 : i32
    %2 = arith.cmpi eq, %arg1, %c0_i32 : i32
    %3 = arith.extui %2 : i1 to i32
    %c0_i32_0 = arith.constant 0 : i32
    %4 = arith.cmpi ne, %3, %c0_i32_0 : i32
    scf.if %4 {
      %cst = arith.constant 0.000000e+00 : f32
      %13 = vector.broadcast %cst : f32 to vector<1x8x5xf32>
      %c0 = arith.constant 0 : index
      %c0_6 = arith.constant 0 : index
      %c0_7 = arith.constant 0 : index
      %14 = vector.load %arg6[%c0, %c0_6, %c0_7] : memref<1x8x5xf32, #tpu.memory_space<vmem>>, vector<1x8x5xf32>
      tpu.vector_store %arg6[%c0, %c0_6, %c0_7], %13 {strides = array<i32>} : memref<1x8x5xf32, #tpu.memory_space<vmem>>, vector<1x8x5xf32>,
      %cst_8 = arith.constant 0.000000e+00 : f32
      %15 = vector.broadcast %cst_8 : f32 to vector<1x8x5xf32>
      %c0_9 = arith.constant 0 : index
      %c0_10 = arith.constant 0 : index
      %c0_11 = arith.constant 0 : index
      %16 = vector.load %arg7[%c0_9, %c0_10, %c0_11] : memref<1x8x5xf32, #tpu.memory_space<vmem>>, vector<1x8x5xf32>
      tpu.vector_store %arg7[%c0_9, %c0_10, %c0_11], %15 {strides = array<i32>} : memref<1x8x5xf32, #tpu.memory_space<vmem>>, vector<1x8x5xf32>,
      %cst_12 = arith.constant 0.000000e+00 : f32
      %17 = vector.broadcast %cst_12 : f32 to vector<1x8x5xf32>
      %c0_13 = arith.constant 0 : index
      %c0_14 = arith.constant 0 : index
      %c0_15 = arith.constant 0 : index
      %18 = vector.load %arg5[%c0_13, %c0_14, %c0_15] : memref<1x8x5xf32, #tpu.memory_space<vmem>>, vector<1x8x5xf32>
      tpu.vector_store %arg5[%c0_13, %c0_14, %c0_15], %17 {strides = array<i32>} : memref<1x8x5xf32, #tpu.memory_space<vmem>>, vector<1x8x5xf32>,
      %c1_i32_16 = arith.constant 1 : i32
      %19 = arith.cmpi slt, %1, %c1_i32_16 : i32
      %20 = arith.extui %19 : i1 to i32
      %c0_i32_17 = arith.constant 0 : i32
      %21 = arith.cmpi ne, %20, %c0_i32_17 : i32
      scf.if %21 {
        %c0_18 = arith.constant 0 : index
        %c0_19 = arith.constant 0 : index
        %22 = vector.load %arg2[%c0_18, %c0_19] : memref<128x5xf32, #tpu.memory_space<vmem>>, vector<1x5xf32>
        %c0_20 = arith.constant 0 : index
        %c0_21 = arith.constant 0 : index
        %23 = vector.load %arg3[%c0_20, %c0_21] : memref<5x5xf32, #tpu.memory_space<vmem>>, vector<5x5xf32>
        %cst_22 = arith.constant dense<0.000000e+00> : vector<1x5xf32>
        %24 = tpu.matmul %22, %23, %cst_22 {dimension_numbers = #tpu.dot_dimension_numbers<[1], [0], [0], [1], [0, 0, 1, 1], [], []>} : vector<1x5xf32>, vector<5x5xf32>, vector<1x5xf32> -> vector<1x5xf32>
        %c0_23 = arith.constant 0 : index
        %c0_24 = arith.constant 0 : index
        %25 = vector.load %arg4[%c0_23, %c0_24] : memref<1x5xf32, #tpu.memory_space<vmem>>, vector<1x5xf32>
        %26 = arith.addf %24, %25 : vector<1x5xf32>
        %27 = vector.shape_cast %26 : vector<1x5xf32> to vector<1x1x5xf32>
        %28 = vector.shape_cast %27 : vector<1x1x5xf32> to vector<1x1x5xf32>
        %29 = vector.broadcast %28 : vector<1x1x5xf32> to vector<1x8x5xf32>
        %c0_25 = arith.constant 0 : index
        %c0_26 = arith.constant 0 : index
        %c0_27 = arith.constant 0 : index
        %30 = vector.load %arg5[%c0_25, %c0_26, %c0_27] : memref<1x8x5xf32, #tpu.memory_space<vmem>>, vector<1x8x5xf32>
        tpu.vector_store %arg5[%c0_25, %c0_26, %c0_27], %29 {strides = array<i32>} : memref<1x8x5xf32, #tpu.memory_space<vmem>>, vector<1x8x5xf32>,
      } else {
      }
    } else {
    }
    %c1_i32_1 = arith.constant 1 : i32
    %5 = arith.cmpi slt, %1, %c1_i32_1 : i32
    %c0_i32_2 = arith.constant 0 : i32
    %6 = arith.cmpi ne, %1, %c0_i32_2 : i32
    %7 = arith.andi %5, %6 : i1
    %8 = arith.extui %7 : i1 to i32
    %c0_i32_3 = arith.constant 0 : i32
    %9 = arith.cmpi ne, %8, %c0_i32_3 : i32
    scf.if %9 {
      %c0 = arith.constant 0 : index
      %c0_6 = arith.constant 0 : index
      %13 = vector.load %arg2[%c0, %c0_6] : memref<128x5xf32, #tpu.memory_space<vmem>>, vector<128x5xf32>
      %c0_7 = arith.constant 0 : index
      %c0_8 = arith.constant 0 : index
      %14 = vector.load %arg3[%c0_7, %c0_8] : memref<5x5xf32, #tpu.memory_space<vmem>>, vector<5x5xf32>
      %cst = arith.constant dense<0.000000e+00> : vector<128x5xf32>
      %15 = tpu.matmul %13, %14, %cst {dimension_numbers = #tpu.dot_dimension_numbers<[1], [0], [0], [1], [0, 0, 1, 1], [], []>} : vector<128x5xf32>, vector<5x5xf32>, vector<128x5xf32> -> vector<128x5xf32>
      %c0_9 = arith.constant 0 : index
      %c0_10 = arith.constant 0 : index
      %16 = vector.load %arg4[%c0_9, %c0_10] : memref<1x5xf32, #tpu.memory_space<vmem>>, vector<1x5xf32>
      %17 = vector.broadcast %16 : vector<1x5xf32> to vector<128x5xf32>
      %18 = arith.addf %15, %17 : vector<128x5xf32>
      %c0_11 = arith.constant 0 : index
      %c0_12 = arith.constant 0 : index
      %c0_13 = arith.constant 0 : index
      %19 = vector.load %arg5[%c0_11, %c0_12, %c0_13] : memref<1x8x5xf32, #tpu.memory_space<vmem>>, vector<1x8x5xf32>
      %20 = vector.extract_strided_slice %19 {offsets = [0, 0, 0], sizes = [1, 1, 5], strides = [1, 1, 1]} : vector<1x8x5xf32> to vector<1x1x5xf32>
      %21 = vector.shape_cast %20 : vector<1x1x5xf32> to vector<1x5xf32>
      %22 = vector.broadcast %21 : vector<1x5xf32> to vector<128x5xf32>
      %23 = arith.subf %18, %22 : vector<128x5xf32>
      %c0_14 = arith.constant 0 : index
      %c0_15 = arith.constant 0 : index
      %c0_16 = arith.constant 0 : index
      %24 = vector.load %arg6[%c0_14, %c0_15, %c0_16] : memref<1x8x5xf32, #tpu.memory_space<vmem>>, vector<1x8x5xf32>
      %cst_17 = arith.constant dense<0.000000e+00> : vector<5xf32>
      %25 = vector.multi_reduction <add>, %23, %cst_17 [0] : vector<128x5xf32> to vector<5xf32>
      %26 = vector.shape_cast %25 : vector<5xf32> to vector<1x5xf32>
      %27 = vector.shape_cast %26 : vector<1x5xf32> to vector<1x1x5xf32>
      %28 = vector.broadcast %27 : vector<1x1x5xf32> to vector<1x8x5xf32>
      %29 = arith.addf %24, %28 : vector<1x8x5xf32>
      %c0_18 = arith.constant 0 : index
      %c0_19 = arith.constant 0 : index
      %c0_20 = arith.constant 0 : index
      %30 = vector.load %arg6[%c0_18, %c0_19, %c0_20] : memref<1x8x5xf32, #tpu.memory_space<vmem>>, vector<1x8x5xf32>
      tpu.vector_store %arg6[%c0_18, %c0_19, %c0_20], %29 {strides = array<i32>} : memref<1x8x5xf32, #tpu.memory_space<vmem>>, vector<1x8x5xf32>,
      %c0_21 = arith.constant 0 : index
      %c0_22 = arith.constant 0 : index
      %c0_23 = arith.constant 0 : index
      %31 = vector.load %arg7[%c0_21, %c0_22, %c0_23] : memref<1x8x5xf32, #tpu.memory_space<vmem>>, vector<1x8x5xf32>
      %32 = arith.mulf %23, %23 : vector<128x5xf32>
      %cst_24 = arith.constant dense<0.000000e+00> : vector<5xf32>
      %33 = vector.multi_reduction <add>, %32, %cst_24 [0] : vector<128x5xf32> to vector<5xf32>
      %34 = vector.shape_cast %33 : vector<5xf32> to vector<1x5xf32>
      %35 = vector.shape_cast %34 : vector<1x5xf32> to vector<1x1x5xf32>
      %36 = vector.broadcast %35 : vector<1x1x5xf32> to vector<1x8x5xf32>
      %37 = arith.addf %31, %36 : vector<1x8x5xf32>
      %c0_25 = arith.constant 0 : index
      %c0_26 = arith.constant 0 : index
      %c0_27 = arith.constant 0 : index
      %38 = vector.load %arg7[%c0_25, %c0_26, %c0_27] : memref<1x8x5xf32, #tpu.memory_space<vmem>>, vector<1x8x5xf32>
      tpu.vector_store %arg7[%c0_25, %c0_26, %c0_27], %37 {strides = array<i32>} : memref<1x8x5xf32, #tpu.memory_space<vmem>>, vector<1x8x5xf32>,
    } else {
    }
    %c0_i32_4 = arith.constant 0 : i32
    %10 = arith.cmpi eq, %1, %c0_i32_4 : i32
    %11 = arith.extui %10 : i1 to i32
    %c0_i32_5 = arith.constant 0 : i32
    %12 = arith.cmpi ne, %11, %c0_i32_5 : i32
    scf.if %12 {
      %13 = tpu.iota {dimensions = array<i32: 0>} : vector<128x1xi32>
      %c16_i32 = arith.constant 16 : i32
      %14 = vector.broadcast %c16_i32 : i32 to vector<128x1xi32>
      %15 = arith.cmpi slt, %13, %14 : vector<128x1xi32>
      %c0 = arith.constant 0 : index
      %c0_6 = arith.constant 0 : index
      %16 = vector.load %arg2[%c0, %c0_6] : memref<128x5xf32, #tpu.memory_space<vmem>>, vector<128x5xf32>
      %cst = arith.constant 0.000000e+00 : f32
      %17 = vector.shape_cast %15 : vector<128x1xi1> to vector<128x1xi1>
      %18 = vector.broadcast %17 : vector<128x1xi1> to vector<128x5xi1>
      %19 = vector.broadcast %cst : f32 to vector<128x5xf32>
      %20 = arith.select %18, %16, %19 : vector<128x5xi1>, vector<128x5xf32>
      %c0_7 = arith.constant 0 : index
      %c0_8 = arith.constant 0 : index
      %21 = vector.load %arg3[%c0_7, %c0_8] : memref<5x5xf32, #tpu.memory_space<vmem>>, vector<5x5xf32>
      %cst_9 = arith.constant dense<0.000000e+00> : vector<128x5xf32>
      %22 = tpu.matmul %20, %21, %cst_9 {dimension_numbers = #tpu.dot_dimension_numbers<[1], [0], [0], [1], [0, 0, 1, 1], [], []>} : vector<128x5xf32>, vector<5x5xf32>, vector<128x5xf32> -> vector<128x5xf32>
      %c0_10 = arith.constant 0 : index
      %c0_11 = arith.constant 0 : index
      %23 = vector.load %arg4[%c0_10, %c0_11] : memref<1x5xf32, #tpu.memory_space<vmem>>, vector<1x5xf32>
      %24 = vector.broadcast %23 : vector<1x5xf32> to vector<128x5xf32>
      %25 = arith.addf %22, %24 : vector<128x5xf32>
      %c0_12 = arith.constant 0 : index
      %c0_13 = arith.constant 0 : index
      %c0_14 = arith.constant 0 : index
      %26 = vector.load %arg5[%c0_12, %c0_13, %c0_14] : memref<1x8x5xf32, #tpu.memory_space<vmem>>, vector<1x8x5xf32>
      %27 = vector.extract_strided_slice %26 {offsets = [0, 0, 0], sizes = [1, 1, 5], strides = [1, 1, 1]} : vector<1x8x5xf32> to vector<1x1x5xf32>
      %28 = vector.shape_cast %27 : vector<1x1x5xf32> to vector<1x5xf32>
      %29 = vector.broadcast %28 : vector<1x5xf32> to vector<128x5xf32>
      %30 = arith.subf %25, %29 : vector<128x5xf32>
      %cst_15 = arith.constant 0.000000e+00 : f32
      %31 = vector.shape_cast %15 : vector<128x1xi1> to vector<128x1xi1>
      %32 = vector.broadcast %31 : vector<128x1xi1> to vector<128x5xi1>
      %33 = vector.broadcast %cst_15 : f32 to vector<128x5xf32>
      %34 = arith.select %32, %30, %33 : vector<128x5xi1>, vector<128x5xf32>
      %c0_16 = arith.constant 0 : index
      %c0_17 = arith.constant 0 : index
      %c0_18 = arith.constant 0 : index
      %35 = vector.load %arg6[%c0_16, %c0_17, %c0_18] : memref<1x8x5xf32, #tpu.memory_space<vmem>>, vector<1x8x5xf32>
      %cst_19 = arith.constant dense<0.000000e+00> : vector<5xf32>
      %36 = vector.multi_reduction <add>, %34, %cst_19 [0] : vector<128x5xf32> to vector<5xf32>
      %37 = vector.shape_cast %36 : vector<5xf32> to vector<1x5xf32>
      %38 = vector.shape_cast %37 : vector<1x5xf32> to vector<1x1x5xf32>
      %39 = vector.broadcast %38 : vector<1x1x5xf32> to vector<1x8x5xf32>
      %40 = arith.addf %35, %39 : vector<1x8x5xf32>
      %c0_20 = arith.constant 0 : index
      %c0_21 = arith.constant 0 : index
      %c0_22 = arith.constant 0 : index
      %41 = vector.load %arg6[%c0_20, %c0_21, %c0_22] : memref<1x8x5xf32, #tpu.memory_space<vmem>>, vector<1x8x5xf32>
      tpu.vector_store %arg6[%c0_20, %c0_21, %c0_22], %40 {strides = array<i32>} : memref<1x8x5xf32, #tpu.memory_space<vmem>>, vector<1x8x5xf32>,
      %c0_23 = arith.constant 0 : index
      %c0_24 = arith.constant 0 : index
      %c0_25 = arith.constant 0 : index
      %42 = vector.load %arg7[%c0_23, %c0_24, %c0_25] : memref<1x8x5xf32, #tpu.memory_space<vmem>>, vector<1x8x5xf32>
      %43 = arith.mulf %34, %34 : vector<128x5xf32>
      %cst_26 = arith.constant dense<0.000000e+00> : vector<5xf32>
      %44 = vector.multi_reduction <add>, %43, %cst_26 [0] : vector<128x5xf32> to vector<5xf32>
      %45 = vector.shape_cast %44 : vector<5xf32> to vector<1x5xf32>
      %46 = vector.shape_cast %45 : vector<1x5xf32> to vector<1x1x5xf32>
      %47 = vector.broadcast %46 : vector<1x1x5xf32> to vector<1x8x5xf32>
      %48 = arith.addf %42, %47 : vector<1x8x5xf32>
      %c0_27 = arith.constant 0 : index
      %c0_28 = arith.constant 0 : index
      %c0_29 = arith.constant 0 : index
      %49 = vector.load %arg7[%c0_27, %c0_28, %c0_29] : memref<1x8x5xf32, #tpu.memory_space<vmem>>, vector<1x8x5xf32>
      tpu.vector_store %arg7[%c0_27, %c0_28, %c0_29], %48 {strides = array<i32>} : memref<1x8x5xf32, #tpu.memory_space<vmem>>, vector<1x8x5xf32>,
    } else {
    }
    return
  }
  func.func @transform_0(%arg0: i32, %arg1: i32) -> (i32, i32) {
    %c1_i32 = arith.constant 1 : i32
    %0 = arith.muli %arg0, %c1_i32 : i32
    %1 = arith.addi %0, %arg1 : i32
    %c0_i32 = arith.constant 0 : i32
    %2 = arith.minsi %1, %c0_i32 : i32
    %c0_i32_0 = arith.constant 0 : i32
    %c0_i32_1 = arith.constant 0 : i32
    return %2, %c0_i32_0 : i32, i32
  }
  func.func @transform_1(%arg0: i32, %arg1: i32) -> (i32, i32) {
    %c0_i32 = arith.constant 0 : i32
    %c0_i32_0 = arith.constant 0 : i32
    %c0_i32_1 = arith.constant 0 : i32
    return %c0_i32, %c0_i32_0 : i32, i32
  }
  func.func @transform_2(%arg0: i32, %arg1: i32) -> (i32, i32) {
    %c0_i32 = arith.constant 0 : i32
    %c0_i32_0 = arith.constant 0 : i32
    %c0_i32_1 = arith.constant 0 : i32
    return %c0_i32, %c0_i32_0 : i32, i32
  }
  func.func @transform_3(%arg0: i32, %arg1: i32) -> (i32, i32, i32) {
    %c0_i32 = arith.constant 0 : i32
    %c0_i32_0 = arith.constant 0 : i32
    %c0_i32_1 = arith.constant 0 : i32
    return %arg0, %c0_i32, %c0_i32_0 : i32, i32, i32
  }
  func.func @transform_4(%arg0: i32, %arg1: i32) -> (i32, i32, i32) {
    %c0_i32 = arith.constant 0 : i32
    %c0_i32_0 = arith.constant 0 : i32
    %c0_i32_1 = arith.constant 0 : i32
    return %arg0, %c0_i32, %c0_i32_0 : i32, i32, i32
  }
  func.func @transform_5(%arg0: i32, %arg1: i32) -> (i32, i32, i32) {
    %c0_i32 = arith.constant 0 : i32
    %c0_i32_0 = arith.constant 0 : i32
    %c0_i32_1 = arith.constant 0 : i32
    return %arg0, %c0_i32, %c0_i32_0 : i32, i32, i32
  }
}

module attributes {stable_mosaic.version = 11 : i64} {
  func.func @apply_kernel(%arg0: i32, %arg1: memref<128x5xf32, #tpu.memory_space<vmem>>, %arg2: memref<1x5xf32, #tpu.memory_space<vmem>>, %arg3: memref<1x1xf32, #tpu.memory_space<vmem>>, %arg4: memref<1x128xf32, #tpu.memory_space<vmem>>) attributes {dimension_semantics = [#tpu.dimension_semantics<parallel>], iteration_bounds = array<i64: 1>, scalar_prefetch = 0 : i64, scratch_operands = 0 : i64, tpu.core_type = #tpu.core_type<tc>, window_params = [{transform_indices = @transform_0, window_bounds = array<i64: 128, 5>}, {pipeline_mode = #tpu.pipeline_mode<synchronous>, transform_indices = @transform_1, window_bounds = array<i64: 1, 5>}, {pipeline_mode = #tpu.pipeline_mode<synchronous>, transform_indices = @transform_2, window_bounds = array<i64: 1, 1>}, {transform_indices = @transform_3, window_bounds = array<i64: 1, 128>}]} {
    %c0 = arith.constant 0 : index
    %c0_0 = arith.constant 0 : index
    %0 = vector.load %arg2[%c0, %c0_0] : memref<1x5xf32, #tpu.memory_space<vmem>>, vector<1x5xf32>
    %c0_1 = arith.constant 0 : index
    %c0_2 = arith.constant 0 : index
    %1 = vector.load %arg1[%c0_1, %c0_2] : memref<128x5xf32, #tpu.memory_space<vmem>>, vector<128x5xf32>
    %cst = arith.constant dense<0.000000e+00> : vector<1x128xf32>
    %2 = tpu.matmul %0, %1, %cst {dimension_numbers = #tpu.dot_dimension_numbers<[1], [1], [0], [0], [0, 0, 1, 0], [], []>} : vector<1x5xf32>, vector<128x5xf32>, vector<1x128xf32> -> vector<1x128xf32>
    %c0_3 = arith.constant 0 : index
    %c0_4 = arith.constant 0 : index
    %3 = vector.load %arg3[%c0_3, %c0_4] : memref<1x1xf32, #tpu.memory_space<vmem>>, vector<1x1xf32>
    %4 = vector.broadcast %3 : vector<1x1xf32> to vector<1x128xf32>
    %5 = arith.addf %2, %4 : vector<1x128xf32>
    %c0_5 = arith.constant 0 : index
    %c0_6 = arith.constant 0 : index
    %6 = vector.load %arg4[%c0_5, %c0_6] : memref<1x128xf32, #tpu.memory_space<vmem>>, vector<1x128xf32>
    tpu.vector_store %arg4[%c0_5, %c0_6], %5 {strides = array<i32>} : memref<1x128xf32, #tpu.memory_space<vmem>>, vector<1x128xf32>,
    return
  }
  func.func @transform_0(%arg0: i32) -> (i32, i32) {
    %c0_i32 = arith.constant 0 : i32
    %c0_i32_0 = arith.constant 0 : i32
    return %arg0, %c0_i32 : i32, i32
  }
  func.func @transform_1(%arg0: i32) -> (i32, i32) {
    %c0_i32 = arith.constant 0 : i32
    %c0_i32_0 = arith.constant 0 : i32
    %c0_i32_1 = arith.constant 0 : i32
    return %c0_i32, %c0_i32_0 : i32, i32
  }
  func.func @transform_2(%arg0: i32) -> (i32, i32) {
    %c0_i32 = arith.constant 0 : i32
    %c0_i32_0 = arith.constant 0 : i32
    %c0_i32_1 = arith.constant 0 : i32
    return %c0_i32, %c0_i32_0 : i32, i32
  }
  func.func @transform_3(%arg0: i32) -> (i32, i32) {
    %c0_i32 = arith.constant 0 : i32
    %c0_i32_0 = arith.constant 0 : i32
    return %c0_i32, %arg0 : i32, i32
  }
}

</mosaic_0001>

<bundles_post_ra>
// kernel: linear_regression_forward.3
= control target key start
LH: loop header
LB: loop body
LE: loop exit
PB: predicated region body
PF: predicated region fallthrough
CT: control target
= control target key end

     0   :  { %vm43_vm0 = vcmask 39936   ;;  %v276_v0 = vmov 0.0|0.0   ;;  %vm277_vm2 = vmmov 0   ;;  %v278_v4 = vmov 0.0   ;;  %s380_s0 = inlined_call_operand.vmem [shape: f32[16,5], index: 0, kind: input, shape index: {}]   ;;  %s381_s2 = inlined_call_operand.<no memory space> [shape: f32[1,1], index: 2, kind: input, shape index: {}]   ;;  %s382_s1 = inlined_call_operand.vmem [shape: f32[1,5], index: 1, kind: input, shape index: {}]   ;;  %s383_s3 = inlined_call_operand.vmem [shape: f32[1,128], index: 3, kind: output, shape index: {}]  }
   0x1   :  { %239 = vmatprep.subr.bf16.mxu0 %v276_v0  ;;  %v17_v1 = vld [vmem:[%s380_s0] sm:$0xff]  ;;  %v18_v2 = vld [vmem:[%s380_s0 + $0x8] sm:$0xff]  ;;  %vm308_vm1 = vmpackc.low %vm43_vm0, %vm43_vm0  ;;  %236 = vmatprep.mubr.msk.f32.mxu0 %vm277_vm2, %v278_v4  ;;  %v8_v5 = vstv %s381_s2  ;;  %v279_v7 = vmov 0   ;;  %v39_v31 = vlaneseq }
   0x2   :  { %v240_v6 = vpack.c.bf16 %v18_v2, %v17_v1  ;;  %275 = vset.pattern.permute.xlu0 %v279_v7  ;;  %9 = vst [vmem:[#allocation2] sm:$0x1] %v8_v5  ;;  %v19_v8 = vld [vmem:[%s380_s0 + $0x10] sm:$0xff]  ;;  %v20_v9 = vld [vmem:[%s380_s0 + $0x18] sm:$0xff]  ;;  %v21_v12 = vld [vmem:[%s380_s0 + $0x20] sm:$0xff] }
   0x3   :  { %v244_v10 = vpack.c.bf16 %v20_v9, %v19_v8  ;;  %v22_v13 = vld [vmem:[%s380_s0 + $0x28] sm:$0xff]  ;;  %v23_v15 = vld [vmem:[%s380_s0 + $0x30] sm:$0xff]  ;;  %v24_v16 = vld [vmem:[%s380_s0 + $0x38] sm:$0xff]  ;;  %v40_v32 = vshrl.u32 %v39_v31, 7 }
   0x4   :  { %242 = vmatpush3.bf16.xpose.msk.msra.mxu0 %vm308_vm1, %v240_v6  ;;  %v248_v14 = vpack.c.bf16 %v22_v13, %v21_v12  ;;  %v252_v17 = vpack.c.bf16 %v24_v16, %v23_v15  ;;  %v25_v18 = vld [vmem:[%s380_s0 + $0x40] sm:$0xff]  ;;  %v26_v19 = vld [vmem:[%s380_s0 + $0x48] sm:$0xff]  ;;  %v27_v21 = vld [vmem:[%s380_s0 + $0x50] sm:$0xff] }
   0x5   :  { %243 = vmatprep.subr.bf16.mxu0 %v276_v0  ;;  %v256_v20 = vpack.c.bf16 %v26_v19, %v25_v18  ;;  %v28_v22 = vld [vmem:[%s380_s0 + $0x58] sm:$0xff]  ;;  %v29_v24 = vld [vmem:[%s380_s0 + $0x60] sm:$0xff]  ;;  %v30_v25 = vld [vmem:[%s380_s0 + $0x68] sm:$0xff]  ;;  %v41_v33 = vsub.s32 0, %v40_v32 }
   0x6   :  { %v260_v23 = vpack.c.bf16 %v28_v22, %v27_v21  ;;  %v264_v26 = vpack.c.bf16 %v30_v25, %v29_v24  ;;  %v31_v27 = vld [vmem:[%s380_s0 + $0x70] sm:$0xff]  ;;  %v32_v28 = vld [vmem:[%s380_s0 + $0x78] sm:$0xff]  ;;  %v16_v30 = vld [vmem:[%s382_s1] sm:$0x1] }
   0x7   :  { %v268_v29 = vpack.c.bf16 %v32_v28, %v31_v27 }
   0x9   :  { %v33_v11 = vld [vmem:[#allocation2] sm:$0x1] }
   0xa   :  { %36 = vperm.xlu0 %275, %v33_v11  }
   0xc   :  { %246 = vmatpush3.bf16.xpose.msk.msra.mxu0 %vm308_vm1, %v244_v10 }
   0xd   :  { %247 = vmatprep.subr.bf16.mxu0 %v276_v0 }
  0x14   :  { %250 = vmatpush3.bf16.xpose.msk.msra.mxu0 %vm308_vm1, %v248_v14 }
  0x15   :  { %251 = vmatprep.subr.bf16.mxu0 %v276_v0 }
  0x1c   :  { %254 = vmatpush3.bf16.xpose.msk.msra.mxu0 %vm308_vm1, %v252_v17 }
  0x1d   :  { %255 = vmatprep.subr.bf16.mxu0 %v276_v0 }
  0x24   :  { %258 = vmatpush3.bf16.xpose.msk.msra.mxu0 %vm308_vm1, %v256_v20 }
  0x25   :  { %259 = vmatprep.subr.bf16.mxu0 %v276_v0 }
  0x2c   :  { %262 = vmatpush3.bf16.xpose.msk.msra.mxu0 %vm308_vm1, %v260_v23 }
  0x2d   :  { %263 = vmatprep.subr.bf16.mxu0 %v276_v0 }
  0x34   :  { %266 = vmatpush3.bf16.xpose.msk.msra.mxu0 %vm308_vm1, %v264_v26 }
  0x35   :  { %267 = vmatprep.subr.bf16.mxu0 %v276_v0 }
  0x3c   :  { %270 = vmatpush3.bf16.xpose.msk.msra.mxu0 %vm308_vm1, %v268_v29 }
  0x43   :  { %237 = vmatmul.mubr.msk.f32.vlgmr.msra.gmra.mrb[0].mxu0 %vm43_vm0, %v16_v30 }
  0x89   :  { %v37_v34 = vpop.permute.xlu0 %36 }
  0x8a   :  { %v42_v35 = vrot.slane %v37_v34, %v41_v33 }
 0x116   :  { %v161_v36 = vpop.f32.mrb[0].mxu0 }
 0x117   :  { %v162_v37 = vadd.f32 %v161_v36, %v42_v35  ;;  %v238_v38 = vpop.f32.mrb[1].mxu0 }
 0x119   :  { %165 = vst [vmem:[%s383_s3] sm:$0x1] %v162_v37 }

// kernel: linear_regression_forward.2
= control target key start
LH: loop header
LB: loop body
LE: loop exit
PB: predicated region body
PF: predicated region fallthrough
CT: control target
= control target key end

     0   :  { %s1516_s18 = smov 0   ;;  %s1518_s19 = smov 0   ;;  %s1729_s0 = inlined_call_operand.vmem [shape: f32[16,5], index: 0, kind: input, shape index: {}]   ;;  %s1730_s1 = inlined_call_operand.vmem [shape: f32[5,5], index: 1, kind: input, shape index: {}]   ;;  %s1731_s2 = inlined_call_operand.vmem [shape: f32[1,5], index: 2, kind: input, shape index: {}]   ;;  %s1732_s3 = inlined_call_operand.vmem [shape: f32[2,8,5], index: 3, kind: output, shape index: {0}]   ;;  %s1733_s4 = inlined_call_operand.vmem [shape: f32[2,8,5], index: 4, kind: output, shape index: {1}]   ;;  %s1734_s5 = inlined_call_operand.vmem [shape: f32[2,8,5], index: 5, kind: output, shape index: {2}]  }
   0x1   :  { %s1520_s20 = smov 0  }
   0x2 LB: > { %s28_s21 = sadd.s32 1, %s1476_s19  ;;  %p1299_p0 = scmp.ge.s32.totalorder %s1480_s20, 1  ;;  %s1480_s20 = sphi %s1520_s20, %s16_s20   ;;  %s1476_s19 = sphi %s1518_s19, %s1736_s19   ;;  %s1472_s18 = sphi %s1516_s18, %s1735_s18  }
   0x3   : > { %p30_p1 = scmp.ge.s32.totalorder %s28_s21, 2  ;;  %p221_p2 = scmp.lt.s32.totalorder %s1480_s20, 3 }
   0x5   : > { %s1738_s21 = smov (%p30_p1, %s28_s21), 0  ;;  %p222_p3 = pnand %p1299_p0, %p221_p2 }
   0x6   : > { %p262_p4 = scmp.lt.s32.totalorder (!%p222_p3), %s1472_s18, 0  ;;  %p277_p5 = scmp.lt.s32.totalorder (!%p222_p3), %s1472_s18, 1  ;;  %vm294_vm0 = vcmask (!%p222_p3), 39936   ;;  %v1482_v0 = vmov (!%p222_p3), 0.0  }
   0x7   : > { %225 = sbr.rel (%p222_p3) target bundleno = 753 (0x2f1), region = 32  ;;  %p1305_p7 = scmp.ge.s32.totalorder (!%p222_p3), %s1472_s18, 1 }
   0xe   : > { %s263_s22 = scalar_select %p262_p4, %s1472_s18, 0 }
   0xf   : > { %s278_s23 = scalar_select %p277_p5, %s1472_s18, 1 }
  0x10   : > { %s1300_s24 = sshll.u32 %s263_s22, 4  ;;  %301 = sbr.rel (%p1305_p7) target bundleno = 240 (0xf0), region = 40  ;;  %v303_v1 = vld [vmem:[%s1730_s1] sm:$0x1f] (!%p1305_p7)  ;;  %vm308_vm1 = vcmask (!%p1305_p7), 1044480   ;;  %v1483_v2 = vmov (!%p1305_p7), 0.0   ;;  %v382_v4 = vlaneseq (!%p1305_p7) }
  0x11   : > { %p267_p6 = scmp.lt.s32.totalorder %s1300_s24, 1  ;;  %s1302_s25 = sshll.u32 %s278_s23, 3  ;;  %1369 = vmatprep.subr.mxu0 (!%p1305_p7), %v1483_v2  ;;  %vm1484_vm2 = vmmov (!%p1305_p7), 0   ;;  %v304_v6 = vld [vmem:[%s1731_s2] sm:$0x1] (!%p1305_p7) }
  0x12   : > { %s1545_s28 = scalar_lea.vmem %s1733_s4, %s1302_s25  ;;  %s1550_s6 = scalar_lea.vmem %s1734_s5, %s1302_s25  ;;  %1371 = vmatprep.mubr.msk.f32.mxu0 (!%p1305_p7), %vm1484_vm2, %v1483_v2  ;;  %1370 = vmatpush3.msk.msra.mxu0 (!%p1305_p7), %vm308_vm1, %v303_v1  ;;  %v383_v5 = vshrl.u32 (!%p1305_p7), %v382_v4, 7 }
  0x13   : > { %s1740_s24 = smov (!%p267_p6, %s1300_s24), 1  ;;  %295 = vst.msk [vmem:[%s1545_s28] sm:$0xff] %vm294_vm0, %v1482_v0  ;;  %296 = vst.msk [vmem:[%s1550_s6] sm:$0xff] %vm294_vm0, %v1482_v0  ;;  %s1559_s9 = scalar_lea.vmem %s1732_s3, %s1302_s25 }
  0x14   : > { %s1301_s10 = sshll.u32 %s1740_s24, 3  ;;  %297 = vst.msk [vmem:[%s1559_s9] sm:$0xff] %vm294_vm0, %v1482_v0  ;;  %v384_v7 = vsub.s32 (!%p1305_p7), 0, %v383_v5 }
  0x15   : > { %s1566_s13 = scalar_lea.vmem %s1729_s0, %s1301_s10 }
  0x16   : > { %v302_v3 = vld [vmem:[%s1566_s13] sm:$0x1] (!%p1305_p7) }
  0x17   : > { %1372 = vmatmul.mubr.msk.f32.vlgmr.msra.gmra.mrb[0].mxu0 %vm294_vm0, %v302_v3 }
  0xea   : > { %v378_v8 = vpop.f32.mrb[0].mxu0 }
  0xeb   : > { %v379_v9 = vadd.f32 %v378_v8, %v304_v6  ;;  %v1373_v10 = vpop.f32.mrb[1].mxu0 }
  0xed   : > { %v385_v11 = vrot.slane %v379_v9, %v384_v7 }
  0xef   : > { %386 = vst.msk [vmem:[%s1559_s9] sm:$0xff] %vm294_vm0, %v385_v11 }
  0xf0 PF: > { %p388_p8 = scmp.ne.s32.totalorder %s1472_s18, 0 }
  0xf2   : > { %p389_p9 = pnand %p388_p8, %p277_p5 }
  0xf3   : > { %v409_v12 = vld [vmem:[%s1730_s1] sm:$0x1f] (!%p389_p9)  ;;  %vm466_vm3 = vcmask (!%p389_p9), 1044480   ;;  %v394_v14 = vld [vmem:[%s1566_s13 + $0x8] sm:$0xff] (!%p389_p9)  ;;  %v395_v15 = vld [vmem:[%s1566_s13 + $0x10] sm:$0xff] (!%p389_p9)  ;;  %v616_v29 = vlaneseq (!%p389_p9) }
  0xf4   : > { %392 = sbr.rel (%p389_p9) target bundleno = 513 (0x201), region = 44  ;;  %v393_v13 = vld [vmem:[%s1566_s13] sm:$0xff] (!%p389_p9)  ;;  %1374 = vmatprep.subr.msk.mxu0 (!%p389_p9), %vm466_vm3, %v409_v12  ;;  %1426 = vmatprep.subr.msk.mxu1 (!%p389_p9), %vm466_vm3, %v409_v12  ;;  %v402_v17 = vld [vmem:[%s1566_s13 + $0x48] sm:$0xff] (!%p389_p9)  ;;  %v403_v18 = vld [vmem:[%s1566_s13 + $0x50] sm:$0xff] (!%p389_p9) }
  0xf5   : > { %1376 = vmatprep.mubr.msk.f32.mxu0 (!%p389_p9), %vm294_vm0, %v393_v13  ;;  %1375 = vmatpush3.msk.msra.mxu0 (!%p389_p9), %vm466_vm3, %v409_v12  ;;  %v401_v16 = vld [vmem:[%s1566_s13 + $0x40] sm:$0xff] (!%p389_p9)  ;;  %v396_v19 = vld [vmem:[%s1566_s13 + $0x18] sm:$0xff] (!%p389_p9)  ;;  %v398_v23 = vld [vmem:[%s1566_s13 + $0x28] sm:$0xff] (!%p389_p9)  ;;  %v617_v30 = vshrl.u32 (!%p389_p9), %v616_v29, 7 }
  0xf6   : > { %1377 = vmatmul.mubr.msk.f32.vlgmr.msra.gmra.mrb[0].mxu0 (!%p389_p9), %vm294_vm0, %v394_v14  ;;  %1427 = vmatpush3.msk.msra.mxu1 (!%p389_p9), %vm466_vm3, %v409_v12  ;;  %v397_v20 = vld [vmem:[%s1566_s13 + $0x20] sm:$0xff] (!%p389_p9)  ;;  %v404_v21 = vld [vmem:[%s1566_s13 + $0x58] sm:$0xff] (!%p389_p9)  ;;  %v399_v24 = vld [vmem:[%s1566_s13 + $0x30] sm:$0xff] (!%p389_p9) }
  0xf7   : > { %1379 = vmatprep.mubr.msk.f32.mxu0 (!%p389_p9), %vm294_vm0, %v395_v15  ;;  %1388 = vmatprep.mubr.msk.f32.mxu1 (!%p389_p9), %vm294_vm0, %v401_v16  ;;  %v405_v22 = vld [vmem:[%s1566_s13 + $0x60] sm:$0xff] (!%p389_p9)  ;;  %v406_v25 = vld [vmem:[%s1566_s13 + $0x68] sm:$0xff] (!%p389_p9)  ;;  %v407_v26 = vld [vmem:[%s1566_s13 + $0x70] sm:$0xff] (!%p389_p9)  ;;  %v618_v31 = vsub.s32 (!%p389_p9), 0, %v617_v30 }
  0xf8   : > { %1389 = vmatmul.mubr.msk.f32.vlgmr.msra.gmra.mrb[0].mxu1 (!%p389_p9), %vm294_vm0, %v402_v17  ;;  %v400_v27 = vld [vmem:[%s1566_s13 + $0x38] sm:$0xff] (!%p389_p9)  ;;  %v615_v32 = vld [vmem:[%s1559_s9] sm:$0xff] (!%p389_p9) }
  0xf9   : > { %1391 = vmatprep.mubr.msk.f32.mxu1 (!%p389_p9), %vm294_vm0, %v403_v18  ;;  %v408_v28 = vld [vmem:[%s1566_s13 + $0x78] sm:$0xff] (!%p389_p9)  ;;  %v1623_v33 = vld [vmem:[%s1731_s2] ss:$0 sm:$0xff] (!%p389_p9)  ;;  %v1625_v34 = vrot.slane (!%p389_p9), %v615_v32, %v618_v31 }
  0xfa   : > { %1380 = vmatmul.mubr.msk.f32.gmra.mrb[2].mxu0 (!%p389_p9), %vm294_vm0, %v396_v19 }
  0xfb   : > { %1382 = vmatprep.mubr.msk.f32.mxu0 %vm294_vm0, %v397_v20 }
  0xfc   : > { %1392 = vmatmul.mubr.msk.f32.gmra.mrb[2].mxu1 %vm294_vm0, %v404_v21 }
  0xfd   : > { %1394 = vmatprep.mubr.msk.f32.mxu1 %vm294_vm0, %v405_v22 }
  0xfe   : > { %1383 = vmatmul.mubr.msk.f32.gmra.mrb[4].mxu0 %vm294_vm0, %v398_v23 }
  0xff   : > { %1385 = vmatprep.mubr.msk.f32.mxu0 %vm294_vm0, %v399_v24 }
 0x100   : > { %1395 = vmatmul.mubr.msk.f32.gmra.mrb[4].mxu1 %vm294_vm0, %v406_v25 }
 0x101   : > { %1397 = vmatprep.mubr.msk.f32.mxu1 %vm294_vm0, %v407_v26 }
 0x102   : > { %1386 = vmatmul.mubr.msk.f32.gmra.mrb[6].mxu0 %vm294_vm0, %v400_v27 }
 0x104   : > { %1398 = vmatmul.mubr.msk.f32.gmra.mrb[6].mxu1 %vm294_vm0, %v408_v28 }
 0x1c9   : > { %v1378_v35 = vpop.f32.mrb[0].mxu0 }
 0x1ca   : > { %v542_v36 = vadd.f32 %v1378_v35, %v1623_v33  ;;  %v536_v37 = vpop.f32.mrb[1].mxu0 }
 0x1cb   : > { %v537_v38 = vadd.f32 %v1623_v33, %v536_v37  ;;  %v1390_v39 = vpop.f32.mrb[0].mxu1 }
 0x1cc   : > { %v621_v40 = vsub.f32 %v542_v36, %v1625_v34  ;;  %v576_v41 = vpop.f32.mrb[1].mxu1  ;;  %v582_v6 = vadd.f32 %v1390_v39, %v1623_v33 }
 0x1cd   : > { %v620_v42 = vsub.f32 %v537_v38, %v1625_v34  ;;  %v1381_v43 = vpop.f32.mrb[2].mxu0  ;;  %v577_v55 = vadd.f32 %v1623_v33, %v576_v41 }
 0x1ce   : > { %v638_v44 = vsel %vm294_vm0, %v621_v40, 0.0  ;;  %v678_v45 = vmul.f32 %v621_v40, %v621_v40  ;;  %v552_v46 = vadd.f32 %v1381_v43, %v1623_v33  ;;  %v546_v47 = vpop.f32.mrb[3].mxu0  ;;  %v629_v26 = vsub.f32 %v582_v6, %v1625_v34 }
 0x1cf   : > { %v637_v48 = vsel %vm294_vm0, %v620_v42, 0.0  ;;  %v677_v49 = vmul.f32 %v620_v42, %v620_v42  ;;  %v547_v50 = vadd.f32 %v1623_v33, %v546_v47  ;;  %v1393_v51 = vpop.f32.mrb[2].mxu1  ;;  %v628_v7 = vsub.f32 %v577_v55, %v1625_v34 }
 0x1d0   : > { %v694_v52 = vsel %vm294_vm0, %v678_v45, 0.0  ;;  %v639_v53 = vadd.f32 %v638_v44, %v637_v48  ;;  %v623_v54 = vsub.f32 %v552_v46, %v1625_v34  ;;  %v586_v56 = vpop.f32.mrb[3].mxu1  ;;  %v592_v38 = vadd.f32 %v1393_v51, %v1623_v33 }
 0x1d1   : > { %v693_v57 = vsel %vm294_vm0, %v677_v49, 0.0  ;;  %v622_v58 = vsub.f32 %v547_v50, %v1625_v34  ;;  %v1384_v59 = vpop.f32.mrb[4].mxu0  ;;  %v587_v18 = vadd.f32 %v1623_v33, %v586_v56  ;;  %v685_v27 = vmul.f32 %v628_v7, %v628_v7 }
 0x1d2   : > { %v695_v60 = vadd.f32 %v694_v52, %v693_v57  ;;  %v680_v61 = vmul.f32 %v623_v54, %v623_v54  ;;  %v562_v62 = vadd.f32 %v1384_v59, %v1623_v33  ;;  %v556_v63 = vpop.f32.mrb[5].mxu0  ;;  %v642_v9 = vsel %vm294_vm0, %v623_v54, 0.0 }
 0x1d3   : > { %v640_v0 = vsel %vm294_vm0, %v622_v58, 0.0  ;;  %v679_v1 = vmul.f32 %v622_v58, %v622_v58  ;;  %v557_v2 = vadd.f32 %v1623_v33, %v556_v63  ;;  %v1396_v3 = vpop.f32.mrb[4].mxu1  ;;  %v630_v42 = vsub.f32 %v587_v18, %v1625_v34 }
 0x1d4   : > { %v641_v4 = vadd.f32 %v640_v0, %v639_v53  ;;  %v625_v5 = vsub.f32 %v562_v62, %v1625_v34  ;;  %v596_v8 = vpop.f32.mrb[5].mxu1  ;;  %v698_v10 = vsel %vm294_vm0, %v680_v61, 0.0  ;;  %v686_v45 = vmul.f32 %v629_v26, %v629_v26 }
 0x1d5   : > { %v696_v11 = vsel %vm294_vm0, %v679_v1, 0.0  ;;  %v624_v12 = vsub.f32 %v557_v2, %v1625_v34  ;;  %v1387_v13 = vpop.f32.mrb[6].mxu0  ;;  %v652_v48 = vsel %vm294_vm0, %v628_v7, 0.0  ;;  %v708_v49 = vsel %vm294_vm0, %v685_v27, 0.0 }
 0x1d6   : > { %v697_v14 = vadd.f32 %v696_v11, %v695_v60  ;;  %v682_v15 = vmul.f32 %v625_v5, %v625_v5  ;;  %v643_v16 = vadd.f32 %v642_v9, %v641_v4  ;;  %v566_v17 = vpop.f32.mrb[7].mxu0  ;;  %v572_v21 = vadd.f32 %v1387_v13, %v1623_v33 }
 0x1d7   : > { %v644_v19 = vsel %vm294_vm0, %v624_v12, 0.0  ;;  %v681_v20 = vmul.f32 %v624_v12, %v624_v12  ;;  %v567_v22 = vadd.f32 %v1623_v33, %v566_v17  ;;  %v1399_v23 = vpop.f32.mrb[6].mxu1  ;;  %v646_v29 = vsel %vm294_vm0, %v625_v5, 0.0 }
 0x1d8   : > { %v645_v24 = vadd.f32 %v644_v19, %v643_v16  ;;  %v699_v25 = vadd.f32 %v698_v10, %v697_v14  ;;  %v606_v28 = vpop.f32.mrb[7].mxu1  ;;  %v627_v31 = vsub.f32 %v572_v21, %v1625_v34  ;;  %v702_v35 = vsel %vm294_vm0, %v682_v15, 0.0 }
 0x1d9   : > { %v700_v30 = vsel %vm294_vm0, %v681_v20, 0.0  ;;  %v626_v32 = vsub.f32 %v567_v22, %v1625_v34  ;;  %v631_v51 = vsub.f32 %v592_v38, %v1625_v34  ;;  %v602_v53 = vadd.f32 %v1396_v3, %v1623_v33 }
 0x1da   : > { %v701_v36 = vadd.f32 %v700_v30, %v699_v25  ;;  %v647_v37 = vadd.f32 %v646_v29, %v645_v24  ;;  %v684_v39 = vmul.f32 %v627_v31, %v627_v31  ;;  %v650_v46 = vsel %vm294_vm0, %v627_v31, 0.0 }
 0x1db   : > { %v648_v40 = vsel %vm294_vm0, %v626_v32, 0.0  ;;  %v683_v41 = vmul.f32 %v626_v32, %v626_v32  ;;  %v687_v55 = vmul.f32 %v630_v42, %v630_v42  ;;  %v597_v56 = vadd.f32 %v1623_v33, %v596_v8 }
 0x1dc   : > { %v649_v43 = vadd.f32 %v648_v40, %v647_v37  ;;  %v703_v44 = vadd.f32 %v702_v35, %v701_v36  ;;  %v706_v54 = vsel %vm294_vm0, %v684_v39, 0.0  ;;  %v607_v57 = vadd.f32 %v1623_v33, %v606_v28 }
 0x1dd   : > { %v704_v47 = vsel %vm294_vm0, %v683_v41, 0.0  ;;  %v654_v60 = vsel %vm294_vm0, %v629_v26, 0.0  ;;  %v710_v61 = vsel %vm294_vm0, %v686_v45, 0.0  ;;  %v656_v62 = vsel %vm294_vm0, %v630_v42, 0.0 }
 0x1de   : > { %v705_v50 = vadd.f32 %v704_v47, %v703_v44  ;;  %v651_v52 = vadd.f32 %v650_v46, %v649_v43  ;;  %v632_v63 = vsub.f32 %v597_v56, %v1625_v34  ;;  %v688_v1 = vmul.f32 %v631_v51, %v631_v51  ;;  %v636_v44 = vld [vmem:[%s1545_s28] sm:$0xff] }
 0x1df   : > { %v633_v3 = vsub.f32 %v602_v53, %v1625_v34  ;;  %v712_v4 = vsel %vm294_vm0, %v687_v55, 0.0  ;;  %v612_v6 = vadd.f32 %v1399_v23, %v1623_v33  ;;  %v634_v7 = vsub.f32 %v607_v57, %v1625_v34  ;;  %v676_v47 = vld [vmem:[%s1550_s6] sm:$0xff] }
 0x1e0   : > { %v653_v58 = vadd.f32 %v652_v48, %v651_v52  ;;  %v707_v59 = vadd.f32 %v706_v54, %v705_v50  ;;  %v689_v5 = vmul.f32 %v632_v63, %v632_v63  ;;  %v658_v10 = vsel %vm294_vm0, %v631_v51, 0.0 }
 0x1e1   : > { %v660_v11 = vsel %vm294_vm0, %v632_v63, 0.0  ;;  %v714_v12 = vsel %vm294_vm0, %v688_v1, 0.0  ;;  %v690_v15 = vmul.f32 %v633_v3, %v633_v3  ;;  %v635_v17 = vsub.f32 %v612_v6, %v1625_v34 }
 0x1e2   : > { %v709_v0 = vadd.f32 %v708_v49, %v707_v59  ;;  %v655_v2 = vadd.f32 %v654_v60, %v653_v58  ;;  %v716_v16 = vsel %vm294_vm0, %v689_v5, 0.0  ;;  %v691_v18 = vmul.f32 %v634_v7, %v634_v7 }
 0x1e3   : > { %v662_v20 = vsel %vm294_vm0, %v633_v3, 0.0  ;;  %v664_v21 = vsel %vm294_vm0, %v634_v7, 0.0  ;;  %v718_v24 = vsel %vm294_vm0, %v690_v15, 0.0  ;;  %v692_v25 = vmul.f32 %v635_v17, %v635_v17 }
 0x1e4   : > { %v657_v8 = vadd.f32 %v656_v62, %v655_v2  ;;  %v711_v9 = vadd.f32 %v710_v61, %v709_v0  ;;  %v720_v26 = vsel %vm294_vm0, %v691_v18, 0.0  ;;  %v666_v29 = vsel %vm294_vm0, %v635_v17, 0.0 }
 0x1e5   : > { %v722_v31 = vsel %vm294_vm0, %v692_v25, 0.0 }
 0x1e6   : > { %v713_v13 = vadd.f32 %v712_v4, %v711_v9  ;;  %v659_v14 = vadd.f32 %v658_v10, %v657_v8 }
 0x1e8   : > { %v661_v19 = vadd.f32 %v660_v11, %v659_v14  ;;  %v715_v33 = vadd.f32 %v714_v12, %v713_v13 }
 0x1ea   : > { %v717_v22 = vadd.f32 %v716_v16, %v715_v33  ;;  %v663_v23 = vadd.f32 %v662_v20, %v661_v19 }
 0x1ec   : > { %v665_v27 = vadd.f32 %v664_v21, %v663_v23  ;;  %v719_v28 = vadd.f32 %v718_v24, %v717_v22 }
 0x1ee   : > { %v667_v34 = vadd.f32 %v666_v29, %v665_v27  ;;  %v721_v30 = vadd.f32 %v720_v26, %v719_v28 }
 0x1f0   : > { %v668_v32 = vrot.slane %v667_v34, 4  ;;  %v723_v35 = vadd.f32 %v722_v31, %v721_v30 }
 0x1f2   : > { %v669_v36 = vadd.f32 %v668_v32, %v667_v34  ;;  %v724_v37 = vrot.slane %v723_v35, 4 }
 0x1f4   : > { %v670_v38 = vrot.slane %v669_v36, 2  ;;  %v725_v39 = vadd.f32 %v724_v37, %v723_v35 }
 0x1f6   : > { %v671_v40 = vadd.f32 %v670_v38, %v669_v36  ;;  %v726_v41 = vrot.slane %v725_v39, 2 }
 0x1f8   : > { %v672_v42 = vrot.slane %v671_v40, 1  ;;  %v727_v43 = vadd.f32 %v726_v41, %v725_v39 }
 0x1fa   : > { %v673_v45 = vadd.f32 %v672_v42, %v671_v40  ;;  %v728_v46 = vrot.slane %v727_v43, 1 }
 0x1fc   : > { %v674_v48 = vadd.f32 %v673_v45, %v636_v44  ;;  %v729_v49 = vadd.f32 %v728_v46, %v727_v43 }
 0x1fe   : > { %675 = vst.msk [vmem:[%s1545_s28] sm:$0xff] %vm294_vm0, %v674_v48  ;;  %v730_v50 = vadd.f32 %v729_v49, %v676_v47 }
 0x200   : > { %731 = vst.msk [vmem:[%s1550_s6] sm:$0xff] %vm294_vm0, %v730_v50 }
 0x201 PF: > { %735 = sbr.rel (%p388_p8) target bundleno = 753 (0x2f1), region = 48  ;;  %v833_v52 = vld [vmem:[%s1730_s1] sm:$0x1f] (!%p388_p8)  ;;  %vm890_vm4 = vcmask (!%p388_p8), 1044480   ;;  %v770_v53 = vld [vmem:[%s1566_s13 + $0x8] sm:$0xff] (!%p388_p8)  ;;  %v1485_v54 = vmov (!%p388_p8), 0.0   ;;  %v1040_v55 = vlaneseq (!%p388_p8) }
 0x202   : > { %v769_v51 = vld [vmem:[%s1566_s13] sm:$0xff] (!%p388_p8)  ;;  %1400 = vmatprep.subr.msk.mxu0 (!%p388_p8), %vm890_vm4, %v833_v52  ;;  %1428 = vmatprep.subr.msk.mxu1 (!%p388_p8), %vm890_vm4, %v833_v52 }
 0x203   : > { %1402 = vmatprep.mubr.msk.f32.mxu0 (!%p388_p8), %vm294_vm0, %v769_v51  ;;  %1401 = vmatpush3.msk.msra.mxu0 (!%p388_p8), %vm890_vm4, %v833_v52  ;;  %v1041_v56 = vshrl.u32 (!%p388_p8), %v1040_v55, 7  ;;  %v1039_v58 = vld [vmem:[%s1559_s9] sm:$0xff] (!%p388_p8) }
 0x204   : > { %1403 = vmatmul.mubr.msk.f32.vlgmr.msra.gmra.mrb[0].mxu0 (!%p388_p8), %vm294_vm0, %v770_v53  ;;  %1429 = vmatpush3.msk.msra.mxu1 (!%p388_p8), %vm890_vm4, %v833_v52  ;;  %v1327_v59 = vld [vmem:[%s1731_s2] ss:$0 sm:$0xff] (!%p388_p8) }
 0x205   : > { %1414 = vmatprep.mubr.f32.mxu1 (!%p388_p8), %v1485_v54  ;;  %1405 = vmatprep.mubr.f32.mxu0 (!%p388_p8), %v1485_v54  ;;  %v1042_v57 = vsub.s32 (!%p388_p8), 0, %v1041_v56  ;;  %v1076_v32 = vld [vmem:[%s1545_s28] sm:$0xff] (!%p388_p8) }
 0x206   : > { %1415 = vmatmul.mubr.f32.vlgmr.msra.gmra.mrb[0].mxu1 (!%p388_p8), %v1485_v54 }
 0x207   : > { %1417 = vmatprep.mubr.f32.mxu1 (!%p388_p8), %v1485_v54  ;;  %v1043_v60 = vrot.slane (!%p388_p8), %v1039_v58, %v1042_v57  ;;  %v1116_v37 = vld [vmem:[%s1550_s6] sm:$0xff] (!%p388_p8) }
 0x208   : > { %1406 = vmatmul.mubr.f32.gmra.mrb[2].mxu0 %v1485_v54 }
 0x209   : > { %1408 = vmatprep.mubr.f32.mxu0 %v1485_v54 }
 0x20a   : > { %1418 = vmatmul.mubr.f32.gmra.mrb[2].mxu1 %v1485_v54 }
 0x20b   : > { %1420 = vmatprep.mubr.f32.mxu1 %v1485_v54 }
 0x20c   : > { %1409 = vmatmul.mubr.f32.gmra.mrb[4].mxu0 %v1485_v54 }
 0x20d   : > { %1411 = vmatprep.mubr.f32.mxu0 %v1485_v54 }
 0x20e   : > { %1421 = vmatmul.mubr.f32.gmra.mrb[4].mxu1 %v1485_v54 }
 0x20f   : > { %1423 = vmatprep.mubr.f32.mxu1 %v1485_v54 }
 0x210   : > { %1412 = vmatmul.mubr.f32.gmra.mrb[6].mxu0 %v1485_v54 }
 0x212   : > { %1424 = vmatmul.mubr.f32.gmra.mrb[6].mxu1 %v1485_v54 }
 0x2d7   : > { %v1404_v61 = vpop.f32.mrb[0].mxu0 }
 0x2d8   : > { %v966_v62 = vadd.f32 %v1404_v61, %v1327_v59  ;;  %v960_v63 = vpop.f32.mrb[1].mxu0 }
 0x2d9   : > { %v961_v0 = vadd.f32 %v1327_v59, %v960_v63  ;;  %v1416_v1 = vpop.f32.mrb[0].mxu1 }
 0x2da   : > { %v1045_v2 = vsub.f32 %v966_v62, %v1043_v60  ;;  %v1000_v3 = vpop.f32.mrb[1].mxu1 }
 0x2db   : > { %v1044_v4 = vsub.f32 %v961_v0, %v1043_v60  ;;  %v1407_v5 = vpop.f32.mrb[2].mxu0 }
 0x2dc   : > { %v1078_v6 = vsel %vm294_vm0, %v1045_v2, 0.0  ;;  %v1118_v7 = vmul.f32 %v1045_v2, %v1045_v2  ;;  %v970_v8 = vpop.f32.mrb[3].mxu0 }
 0x2dd   : > { %v1077_v9 = vsel %vm294_vm0, %v1044_v4, 0.0  ;;  %v1117_v10 = vmul.f32 %v1044_v4, %v1044_v4  ;;  %v1419_v11 = vpop.f32.mrb[2].mxu1 }
 0x2de   : > { %v1134_v12 = vsel %vm294_vm0, %v1118_v7, 0.0  ;;  %v1079_v13 = vadd.f32 %v1078_v6, %v1077_v9  ;;  %v1010_v14 = vpop.f32.mrb[3].mxu1 }
 0x2df   : > { %v1133_v15 = vsel %vm294_vm0, %v1117_v10, 0.0  ;;  %v1410_v16 = vpop.f32.mrb[4].mxu0 }
 0x2e0   : > { %v1108_v17 = vrot.slane %v1079_v13, 4  ;;  %v1135_v18 = vadd.f32 %v1134_v12, %v1133_v15  ;;  %v980_v19 = vpop.f32.mrb[5].mxu0 }
 0x2e1   : > { %v1422_v33 = vpop.f32.mrb[4].mxu1 }
 0x2e2   : > { %v1109_v20 = vadd.f32 %v1108_v17, %v1079_v13  ;;  %v1164_v21 = vrot.slane %v1135_v18, 4  ;;  %v1020_v22 = vpop.f32.mrb[5].mxu1 }
 0x2e3   : > { %v1413_v23 = vpop.f32.mrb[6].mxu0 }
 0x2e4   : > { %v1110_v24 = vrot.slane %v1109_v20, 2  ;;  %v1165_v25 = vadd.f32 %v1164_v21, %v1135_v18  ;;  %v990_v26 = vpop.f32.mrb[7].mxu0 }
 0x2e5   : > { %v1425_v27 = vpop.f32.mrb[6].mxu1 }
 0x2e6   : > { %v1111_v28 = vadd.f32 %v1110_v24, %v1109_v20  ;;  %v1166_v29 = vrot.slane %v1165_v25, 2  ;;  %v1030_v34 = vpop.f32.mrb[7].mxu1 }
 0x2e8   : > { %v1112_v30 = vrot.slane %v1111_v28, 1  ;;  %v1167_v31 = vadd.f32 %v1166_v29, %v1165_v25 }
 0x2ea   : > { %v1113_v35 = vadd.f32 %v1112_v30, %v1111_v28  ;;  %v1168_v36 = vrot.slane %v1167_v31, 1 }
 0x2ec   : > { %v1114_v38 = vadd.f32 %v1113_v35, %v1076_v32  ;;  %v1169_v39 = vadd.f32 %v1168_v36, %v1167_v31 }
 0x2ee   : > { %1115 = vst.msk [vmem:[%s1545_s28] sm:$0xff] %vm294_vm0, %v1114_v38  ;;  %v1170_v40 = vadd.f32 %v1169_v39, %v1116_v37 }
 0x2f0   : > { %1171 = vst.msk [vmem:[%s1550_s6] sm:$0xff] %vm294_vm0, %v1170_v40 }
 0x2f1 PF: > { %s16_s20 = sadd.s32 1, %s1480_s20   ;;  %s1735_s18 = smov %s1476_s19 }
 0x2f2   : > { %p13_p10 = scmp.ge.s32.totalorder %s16_s20, 4   ;;  %s1736_s19 = smov %s1738_s21 }
 0x2f4   :  { %15 = sbr.rel (!%p13_p10) target bundleno = 2 (0x2), region = 102 }

</bundles_post_ra>
